<compile_context>
chip_gen: v6e
topology: v6e:2x2x1
jax: 0.10.0
libtpu: 0.0.40
codegen_flags: <defaults>
</compile_context>

<pallas_src>
import functools

import jax
import jax.numpy as jnp
from jax.experimental import pallas as pl
from jax.experimental.pallas import tpu as pltpu


# ----------------------------------------------------------------------------
# Pallas kernel: full GNNRegressor forward
# ----------------------------------------------------------------------------
def _build_kernel(use_a2):
    """Returns the fused forward kernel; `use_a2` selects the SGConv strategy."""

    def kernel(*refs):
        f32 = jnp.float32
        bf16 = jnp.bfloat16

        if use_a2:
            (a_ref, a2_hbm, x_ref, bias_ref, *rest) = refs
            (*param_refs, out_ref, a2_vmem, a2_sem) = rest
        else:
            (a_ref, x_ref, bias_ref, *rest) = refs
            (*param_refs, out_ref) = rest
            a2_hbm = a2_vmem = a2_sem = None

        (w_e1, b_e1, w_e2, b_e2,
         w_g1, b_g1, w_g2, b_g2, w_g3, b_g3,
         w_sg, b_sg,
         w_f1, b_f1, w_f2, b_f2,
         w_head, b_head) = param_refs

        # Kick off the A_hat^2 HBM->VMEM DMA immediately; it completes while the
        # encoder / gcn1..gcn3 matmuls run, so its latency is fully hidden.
        if use_a2:
            a2_copy = pltpu.make_async_copy(a2_hbm, a2_vmem, a2_sem)
            a2_copy.start()

        A = a_ref[...]  # (N, N) bf16 normalized adjacency (already bf16)

        def dense(h, w_ref):
            # (rows, f_in) @ (f_in, f_out), bf16 operands, f32 accumulation
            return jnp.dot(h.astype(bf16), w_ref[...], preferred_element_type=f32)

        def propagate(h, adj):
            # adjacency propagation: adj @ h, bf16 operands, f32 accumulation
            return jnp.dot(adj, h.astype(bf16), preferred_element_type=f32)

        def gcn(h, w_ref, b_ref, relu, propagate_first=False):
            # PyG GCNConv: A_hat @ (h @ W) + b  ==  (A_hat @ h) @ W + b
            if propagate_first:          # cheaper when F_in < F_out
                h = dense(propagate(h, A), w_ref) + b_ref[...]
            else:
                h = propagate(dense(h, w_ref), A) + b_ref[...]
            return jnp.maximum(h, 0.0) if relu else h

        x = x_ref[...]                                            # (N, F) bf16

        # ---- encoder ----
        z = gcn(x, w_e1, b_e1, relu=True, propagate_first=True)   # (N, 128)
        z = gcn(z, w_e2, b_e2, relu=False)                        # (N, 64)

        # ---- regressor GCN stack ----
        z = gcn(z, w_g1, b_g1, relu=True)
        z = gcn(z, w_g2, b_g2, relu=True)
        z = gcn(z, w_g3, b_g3, relu=True)

        # ---- SGConv, K=4: (A_hat^4 @ z) @ W + b ----
        if use_a2:
            a2_copy.wait()                                        # DMA done by now
            A2 = a2_vmem[...]                                     # (N, N) bf16
            h = propagate(propagate(z, A2), A2)                   # A2 @ (A2 @ z)
        else:
            # VMEM-small parts (v7x): skip A^2 residency/DMA, do 4 propagations.
            h = z
            for _ in range(4):
                h = propagate(h, A)
        z = dense(h, w_sg) + b_sg[...]                            # (N, 64)

        # ---- global_max_pool (additive mask: 0 for member, -1e30 otherwise) ----
        # G is tiny (batch size); the static unrolled max is XLU work next to the
        # MXU.  Revisit (fori_loop / vectorized masked max) only if G grows.
        bias = bias_ref[...]                                      # (N, G) f32
        G = bias.shape[1]
        rows = []
        for g in range(G):
            rows.append(jnp.max(z + bias[:, g:g + 1], axis=0, keepdims=True))
        pooled = jnp.concatenate(rows, axis=0)                    # (G, 64)

        # ---- MLP heads (fused cpd/comb output) ----
        h = jnp.maximum(dense(pooled, w_f1) + b_f1[...], 0.0)     # (G, 32)
        h = jnp.maximum(dense(h, w_f2) + b_f2[...], 0.0)          # (G, 16)
        out_ref[...] = dense(h, w_head) + b_head[...]             # (G, 2)

    return kernel


# ----------------------------------------------------------------------------
# Wrapper
# ----------------------------------------------------------------------------
def gnn_regressor_forward(a_hat, a_hat2, x, pool_bias, params):
    """params: flat list [w, b] * 10 in the original module order
    (enc.conv1, enc.conv2, gcn1, gcn2, gcn3, sg, fc1, fc2, out_cpd, out_comb)."""
    N, F = x.shape
    G = pool_bias.shape[1]
    f32 = jnp.float32
    bf16 = jnp.bfloat16

    # ---- generation-aware VMEM budget ----
    try:
        vmem_cap = int(pltpu.get_tpu_info().vmem_capacity_bytes)
    except Exception:  # pragma: no cover - conservative fallback
        vmem_cap = 64 << 20
    vmem_budget = int(vmem_cap * 0.80)     # headroom for Mosaic internal scratch

    # Keep A_hat^2 resident (async-prefetched) only on large-VMEM parts
    # (v5e/v6e, 128 MiB/TC).  On v7x (64 MiB/TC) VMEM residency is the binding
    # constraint, so SGConv uses four A-propagations instead.
    a_bytes = 2 * N * N                    # bf16 adjacency
    use_a2 = (a_hat2 is not None
              and vmem_cap >= (96 << 20)
              and 2 * 2 * a_bytes + (8 << 20) < vmem_budget)

    ws = [p.astype(bf16) for p in params[0::2]]      # MXU operands in bf16
    bs = [p.astype(f32) for p in params[1::2]]

    # Fuse the two 1-wide output heads into a single (16, 2) head.
    w_head = jnp.concatenate([ws[8], ws[9]], axis=1)              # (16, 2) bf16
    b_head = jnp.concatenate([bs[8], bs[9]], axis=1)              # (1, 2)  f32

    kernel_params = []
    for i in range(8):                                            # first 8 layers
        kernel_params += [ws[i], bs[i]]
    kernel_params += [w_head, b_head]

    # TODO(synk): 8-bit A storage (int8 on v5e/v6e, fp8 e4m3 on v7x) would halve
    #             A's HBM + VMEM footprint; kept bf16 here pending accuracy
    #             validation on the comb logit.
    vmem = pltpu.MemorySpace.VMEM
    inputs, in_specs = [], []

    inputs.append(a_hat.astype(bf16))
    in_specs.append(pl.BlockSpec(memory_space=vmem))
    if use_a2:
        inputs.append(a_hat2.astype(bf16))
        in_specs.append(pl.BlockSpec(memory_space=pl.ANY))        # stays in HBM,
    inputs.append(x.astype(bf16))                                  # DMA'd in-kernel
    in_specs.append(pl.BlockSpec(memory_space=vmem))
    inputs.append(pool_bias.astype(f32))
    in_specs.append(pl.BlockSpec(memory_space=vmem))
    for p in kernel_params:
        inputs.append(p)
        in_specs.append(pl.BlockSpec(memory_space=vmem))

    scratch_shapes = []
    if use_a2:
        scratch_shapes = [pltpu.VMEM((N, N), bf16),               # A^2 landing buf
                          pltpu.SemaphoreType.DMA(())]

    # ---- advisory cost estimate for XLA scheduling ----
    n_props = 4 + (2 if use_a2 else 4)                 # conv2,gcn1-3 + SGConv path
    prop_flops = 2 * N * N * (F + 64 * n_props)
    dense_flops = (2 * N * (F * 128 + 128 * 64 + 4 * 64 * 64)
                   + 2 * G * (64 * 32 + 32 * 16 + 16 * 2))
    total_in_bytes = sum(int(a.size) * a.dtype.itemsize for a in inputs)
    out_bytes = G * 2 * 4
    cost = pl.CostEstimate(flops=int(prop_flops + dense_flops),
                           transcendentals=0,
                           bytes_accessed=int(total_in_bytes + out_bytes))

    # Residency estimate: inputs + (A^2 scratch) + widest f32 intermediate (N,128).
    resident = total_in_bytes + (a_bytes if use_a2 else 0) + 4 * N * 128
    vmem_limit = int(min(vmem_budget, max(32 << 20, 2 * resident + (4 << 20))))

    fn = pl.pallas_call(
        _build_kernel(use_a2),
        out_shape=jax.ShapeDtypeStruct((G, 2), f32),
        in_specs=in_specs,
        out_specs=pl.BlockSpec(memory_space=vmem),
        scratch_shapes=scratch_shapes,
        compiler_params=pltpu.CompilerParams(vmem_limit_bytes=vmem_limit),
        cost_estimate=cost,
    )
    out = fn(*inputs)
    return out[:, 0:1], out[:, 1:2]                    # (cpd_pred, comb_logits)


# ----------------------------------------------------------------------------
# Glue: adjacency normalization, pooling bias, deterministic parameter init
# ----------------------------------------------------------------------------
def normalized_adjacency(edge_index, num_nodes):
    # A[dst, src] = 1 for each edge, + self loops, symmetric normalization.
    src, dst = edge_index[0], edge_index[1]
    A = jnp.zeros((num_nodes, num_nodes), jnp.float32).at[dst, src].set(1.0)
    A = A + jnp.eye(num_nodes, dtype=jnp.float32)
    deg = jnp.sum(A, axis=1)
    dinv = jax.lax.rsqrt(jnp.maximum(deg, 1e-12))
    a_hat = dinv[:, None] * A * dinv[None, :]
    a_hat2 = a_hat @ a_hat                # graph-constant, amortized across calls
    return a_hat, a_hat2


def batch_to_pool_bias(batch, num_graphs):
    # (N, G) additive mask: 0.0 for member nodes, -1e30 otherwise.
    member = (batch[:, None] == jnp.arange(num_graphs)[None, :]).astype(jnp.float32)
    return (member - 1.0) * 1e30


def init_params(key, num_features):
    dims = [
        (num_features, 128),  # encoder.conv1
        (128, 64),            # encoder.conv2
        (64, 64),             # gcn1
        (64, 64),             # gcn2
        (64, 64),             # gcn3
        (64, 64),             # sg
        (64, 32),             # fc1
        (32, 16),             # fc2
        (16, 1),              # out_cpd
        (16, 1),              # out_comb
    ]
    params = []
    for (fan_in, fan_out) in dims:
        key, kw, kb = jax.random.split(key, 3)
        scale = 1.0 / jnp.sqrt(jnp.float32(fan_in))
        w = jax.random.uniform(kw, (fan_in, fan_out), jnp.float32, -scale, scale)
        b = jax.random.uniform(kb, (1, fan_out), jnp.float32, -scale, scale)
        params += [w, b]
    return params


if __name__ == "__main__":
    key = jax.random.PRNGKey(0)

    # Small synthetic netlist batch: 2 graphs x 16 nodes, 16 node features.
    num_graphs = 2
    nodes_per_graph = 16
    N = num_graphs * nodes_per_graph
    F = 16

    k_x, k_e, k_p = jax.random.split(key, 3)
    x = jax.random.normal(k_x, (N, F), jnp.float32)

    # Random undirected intra-graph edges (block-diagonal like PyG batching).
    srcs, dsts = [], []
    k = k_e
    for g in range(num_graphs):
        base = g * nodes_per_graph
        k, ks, kd = jax.random.split(k, 3)
        s = base + jax.random.randint(ks, (24,), 0, nodes_per_graph)
        d = base + jax.random.randint(kd, (24,), 0, nodes_per_graph)
        srcs += [s, d]   # both directions -> symmetric
        dsts += [d, s]
    edge_index = jnp.stack([jnp.concatenate(srcs), jnp.concatenate(dsts)], axis=0)

    batch = jnp.repeat(jnp.arange(num_graphs), nodes_per_graph)

    a_hat, a_hat2 = normalized_adjacency(edge_index, N)
    pool_bias = batch_to_pool_bias(batch, num_graphs)
    params = init_params(k_p, F)

    cpd_pred, comb_logits = gnn_regressor_forward(a_hat, a_hat2, x, pool_bias, params)
    jax.block_until_ready((cpd_pred, comb_logits))
    assert cpd_pred.shape == (num_graphs, 1) and comb_logits.shape == (num_graphs, 1)
    assert bool(jnp.all(jnp.isfinite(cpd_pred))) and bool(jnp.all(jnp.isfinite(comb_logits)))
    print("KERNEL_OK")
</pallas_src>

<mosaic_0001>
module attributes {stable_mosaic.version = 11 : i64} {
  func.func @kernel(%arg0: memref<32x32xbf16, #tpu.memory_space<vmem>>, %arg1: memref<32x16xbf16, #tpu.memory_space<vmem>>, %arg2: memref<32x2xf32, #tpu.memory_space<vmem>>, %arg3: memref<16x128xbf16, #tpu.memory_space<vmem>>, %arg4: memref<1x128xf32, #tpu.memory_space<vmem>>, %arg5: memref<128x64xbf16, #tpu.memory_space<vmem>>, %arg6: memref<1x64xf32, #tpu.memory_space<vmem>>, %arg7: memref<64x64xbf16, #tpu.memory_space<vmem>>, %arg8: memref<1x64xf32, #tpu.memory_space<vmem>>, %arg9: memref<64x64xbf16, #tpu.memory_space<vmem>>, %arg10: memref<1x64xf32, #tpu.memory_space<vmem>>, %arg11: memref<64x64xbf16, #tpu.memory_space<vmem>>, %arg12: memref<1x64xf32, #tpu.memory_space<vmem>>, %arg13: memref<64x64xbf16, #tpu.memory_space<vmem>>, %arg14: memref<1x64xf32, #tpu.memory_space<vmem>>, %arg15: memref<64x32xbf16, #tpu.memory_space<vmem>>, %arg16: memref<1x32xf32, #tpu.memory_space<vmem>>, %arg17: memref<32x16xbf16, #tpu.memory_space<vmem>>, %arg18: memref<1x16xf32, #tpu.memory_space<vmem>>, %arg19: memref<16x2xbf16, #tpu.memory_space<vmem>>, %arg20: memref<1x2xf32, #tpu.memory_space<vmem>>, %arg21: memref<2x2xf32, #tpu.memory_space<vmem>>) attributes {dimension_semantics = [], scalar_prefetch = 0 : i64, scratch_operands = 0 : i64, tpu.core_type = #tpu.core_type<tc>} {
    %c0 = arith.constant 0 : index
    %c0_0 = arith.constant 0 : index
    %0 = vector.load %arg0[%c0, %c0_0] : memref<32x32xbf16, #tpu.memory_space<vmem>>, vector<32x32xbf16>
    %c0_1 = arith.constant 0 : index
    %c0_2 = arith.constant 0 : index
    %1 = vector.load %arg1[%c0_1, %c0_2] : memref<32x16xbf16, #tpu.memory_space<vmem>>, vector<32x16xbf16>
    %cst = arith.constant dense<0.000000e+00> : vector<32x16xf32>
    %2 = tpu.matmul %0, %1, %cst {dimension_numbers = #tpu.dot_dimension_numbers<[1], [0], [0], [1], [0, 0, 1, 1], [], []>} : vector<32x32xbf16>, vector<32x16xbf16>, vector<32x16xf32> -> vector<32x16xf32>
    %3 = arith.truncf %2 : vector<32x16xf32> to vector<32x16xbf16>
    %c0_3 = arith.constant 0 : index
    %c0_4 = arith.constant 0 : index
    %4 = vector.load %arg3[%c0_3, %c0_4] : memref<16x128xbf16, #tpu.memory_space<vmem>>, vector<16x128xbf16>
    %cst_5 = arith.constant dense<0.000000e+00> : vector<32x128xf32>
    %5 = tpu.matmul %3, %4, %cst_5 {dimension_numbers = #tpu.dot_dimension_numbers<[1], [0], [0], [1], [0, 0, 1, 1], [], []>} : vector<32x16xbf16>, vector<16x128xbf16>, vector<32x128xf32> -> vector<32x128xf32>
    %c0_6 = arith.constant 0 : index
    %c0_7 = arith.constant 0 : index
    %6 = vector.load %arg4[%c0_6, %c0_7] : memref<1x128xf32, #tpu.memory_space<vmem>>, vector<1x128xf32>
    %7 = vector.broadcast %6 : vector<1x128xf32> to vector<32x128xf32>
    %8 = arith.addf %5, %7 : vector<32x128xf32>
    %cst_8 = arith.constant 0.000000e+00 : f32
    %9 = vector.broadcast %cst_8 : f32 to vector<32x128xf32>
    %10 = arith.maximumf %8, %9 : vector<32x128xf32>
    %11 = arith.truncf %10 : vector<32x128xf32> to vector<32x128xbf16>
    %c0_9 = arith.constant 0 : index
    %c0_10 = arith.constant 0 : index
    %12 = vector.load %arg5[%c0_9, %c0_10] : memref<128x64xbf16, #tpu.memory_space<vmem>>, vector<128x64xbf16>
    %cst_11 = arith.constant dense<0.000000e+00> : vector<32x64xf32>
    %13 = tpu.matmul %11, %12, %cst_11 {dimension_numbers = #tpu.dot_dimension_numbers<[1], [0], [0], [1], [0, 0, 1, 1], [], []>} : vector<32x128xbf16>, vector<128x64xbf16>, vector<32x64xf32> -> vector<32x64xf32>
    %14 = arith.truncf %13 : vector<32x64xf32> to vector<32x64xbf16>
    %cst_12 = arith.constant dense<0.000000e+00> : vector<32x64xf32>
    %15 = tpu.matmul %0, %14, %cst_12 {dimension_numbers = #tpu.dot_dimension_numbers<[1], [0], [0], [1], [0, 0, 1, 1], [], []>} : vector<32x32xbf16>, vector<32x64xbf16>, vector<32x64xf32> -> vector<32x64xf32>
    %c0_13 = arith.constant 0 : index
    %c0_14 = arith.constant 0 : index
    %16 = vector.load %arg6[%c0_13, %c0_14] : memref<1x64xf32, #tpu.memory_space<vmem>>, vector<1x64xf32>
    %17 = vector.broadcast %16 : vector<1x64xf32> to vector<32x64xf32>
    %18 = arith.addf %15, %17 : vector<32x64xf32>
    %19 = arith.truncf %18 : vector<32x64xf32> to vector<32x64xbf16>
    %c0_15 = arith.constant 0 : index
    %c0_16 = arith.constant 0 : index
    %20 = vector.load %arg7[%c0_15, %c0_16] : memref<64x64xbf16, #tpu.memory_space<vmem>>, vector<64x64xbf16>
    %cst_17 = arith.constant dense<0.000000e+00> : vector<32x64xf32>
    %21 = tpu.matmul %19, %20, %cst_17 {dimension_numbers = #tpu.dot_dimension_numbers<[1], [0], [0], [1], [0, 0, 1, 1], [], []>} : vector<32x64xbf16>, vector<64x64xbf16>, vector<32x64xf32> -> vector<32x64xf32>
    %22 = arith.truncf %21 : vector<32x64xf32> to vector<32x64xbf16>
    %cst_18 = arith.constant dense<0.000000e+00> : vector<32x64xf32>
    %23 = tpu.matmul %0, %22, %cst_18 {dimension_numbers = #tpu.dot_dimension_numbers<[1], [0], [0], [1], [0, 0, 1, 1], [], []>} : vector<32x32xbf16>, vector<32x64xbf16>, vector<32x64xf32> -> vector<32x64xf32>
    %c0_19 = arith.constant 0 : index
    %c0_20 = arith.constant 0 : index
    %24 = vector.load %arg8[%c0_19, %c0_20] : memref<1x64xf32, #tpu.memory_space<vmem>>, vector<1x64xf32>
    %25 = vector.broadcast %24 : vector<1x64xf32> to vector<32x64xf32>
    %26 = arith.addf %23, %25 : vector<32x64xf32>
    %cst_21 = arith.constant 0.000000e+00 : f32
    %27 = vector.broadcast %cst_21 : f32 to vector<32x64xf32>
    %28 = arith.maximumf %26, %27 : vector<32x64xf32>
    %29 = arith.truncf %28 : vector<32x64xf32> to vector<32x64xbf16>
    %c0_22 = arith.constant 0 : index
    %c0_23 = arith.constant 0 : index
    %30 = vector.load %arg9[%c0_22, %c0_23] : memref<64x64xbf16, #tpu.memory_space<vmem>>, vector<64x64xbf16>
    %cst_24 = arith.constant dense<0.000000e+00> : vector<32x64xf32>
    %31 = tpu.matmul %29, %30, %cst_24 {dimension_numbers = #tpu.dot_dimension_numbers<[1], [0], [0], [1], [0, 0, 1, 1], [], []>} : vector<32x64xbf16>, vector<64x64xbf16>, vector<32x64xf32> -> vector<32x64xf32>
    %32 = arith.truncf %31 : vector<32x64xf32> to vector<32x64xbf16>
    %cst_25 = arith.constant dense<0.000000e+00> : vector<32x64xf32>
    %33 = tpu.matmul %0, %32, %cst_25 {dimension_numbers = #tpu.dot_dimension_numbers<[1], [0], [0], [1], [0, 0, 1, 1], [], []>} : vector<32x32xbf16>, vector<32x64xbf16>, vector<32x64xf32> -> vector<32x64xf32>
    %c0_26 = arith.constant 0 : index
    %c0_27 = arith.constant 0 : index
    %34 = vector.load %arg10[%c0_26, %c0_27] : memref<1x64xf32, #tpu.memory_space<vmem>>, vector<1x64xf32>
    %35 = vector.broadcast %34 : vector<1x64xf32> to vector<32x64xf32>
    %36 = arith.addf %33, %35 : vector<32x64xf32>
    %cst_28 = arith.constant 0.000000e+00 : f32
    %37 = vector.broadcast %cst_28 : f32 to vector<32x64xf32>
    %38 = arith.maximumf %36, %37 : vector<32x64xf32>
    %39 = arith.truncf %38 : vector<32x64xf32> to vector<32x64xbf16>
    %c0_29 = arith.constant 0 : index
    %c0_30 = arith.constant 0 : index
    %40 = vector.load %arg11[%c0_29, %c0_30] : memref<64x64xbf16, #tpu.memory_space<vmem>>, vector<64x64xbf16>
    %cst_31 = arith.constant dense<0.000000e+00> : vector<32x64xf32>
    %41 = tpu.matmul %39, %40, %cst_31 {dimension_numbers = #tpu.dot_dimension_numbers<[1], [0], [0], [1], [0, 0, 1, 1], [], []>} : vector<32x64xbf16>, vector<64x64xbf16>, vector<32x64xf32> -> vector<32x64xf32>
    %42 = arith.truncf %41 : vector<32x64xf32> to vector<32x64xbf16>
    %cst_32 = arith.constant dense<0.000000e+00> : vector<32x64xf32>
    %43 = tpu.matmul %0, %42, %cst_32 {dimension_numbers = #tpu.dot_dimension_numbers<[1], [0], [0], [1], [0, 0, 1, 1], [], []>} : vector<32x32xbf16>, vector<32x64xbf16>, vector<32x64xf32> -> vector<32x64xf32>
    %c0_33 = arith.constant 0 : index
    %c0_34 = arith.constant 0 : index
    %44 = vector.load %arg12[%c0_33, %c0_34] : memref<1x64xf32, #tpu.memory_space<vmem>>, vector<1x64xf32>
    %45 = vector.broadcast %44 : vector<1x64xf32> to vector<32x64xf32>
    %46 = arith.addf %43, %45 : vector<32x64xf32>
    %cst_35 = arith.constant 0.000000e+00 : f32
    %47 = vector.broadcast %cst_35 : f32 to vector<32x64xf32>
    %48 = arith.maximumf %46, %47 : vector<32x64xf32>
    %49 = arith.truncf %48 : vector<32x64xf32> to vector<32x64xbf16>
    %cst_36 = arith.constant dense<0.000000e+00> : vector<32x64xf32>
    %50 = tpu.matmul %0, %49, %cst_36 {dimension_numbers = #tpu.dot_dimension_numbers<[1], [0], [0], [1], [0, 0, 1, 1], [], []>} : vector<32x32xbf16>, vector<32x64xbf16>, vector<32x64xf32> -> vector<32x64xf32>
    %51 = arith.truncf %50 : vector<32x64xf32> to vector<32x64xbf16>
    %cst_37 = arith.constant dense<0.000000e+00> : vector<32x64xf32>
    %52 = tpu.matmul %0, %51, %cst_37 {dimension_numbers = #tpu.dot_dimension_numbers<[1], [0], [0], [1], [0, 0, 1, 1], [], []>} : vector<32x32xbf16>, vector<32x64xbf16>, vector<32x64xf32> -> vector<32x64xf32>
    %53 = arith.truncf %52 : vector<32x64xf32> to vector<32x64xbf16>
    %cst_38 = arith.constant dense<0.000000e+00> : vector<32x64xf32>
    %54 = tpu.matmul %0, %53, %cst_38 {dimension_numbers = #tpu.dot_dimension_numbers<[1], [0], [0], [1], [0, 0, 1, 1], [], []>} : vector<32x32xbf16>, vector<32x64xbf16>, vector<32x64xf32> -> vector<32x64xf32>
    %55 = arith.truncf %54 : vector<32x64xf32> to vector<32x64xbf16>
    %cst_39 = arith.constant dense<0.000000e+00> : vector<32x64xf32>
    %56 = tpu.matmul %0, %55, %cst_39 {dimension_numbers = #tpu.dot_dimension_numbers<[1], [0], [0], [1], [0, 0, 1, 1], [], []>} : vector<32x32xbf16>, vector<32x64xbf16>, vector<32x64xf32> -> vector<32x64xf32>
    %57 = arith.truncf %56 : vector<32x64xf32> to vector<32x64xbf16>
    %c0_40 = arith.constant 0 : index
    %c0_41 = arith.constant 0 : index
    %58 = vector.load %arg13[%c0_40, %c0_41] : memref<64x64xbf16, #tpu.memory_space<vmem>>, vector<64x64xbf16>
    %cst_42 = arith.constant dense<0.000000e+00> : vector<32x64xf32>
    %59 = tpu.matmul %57, %58, %cst_42 {dimension_numbers = #tpu.dot_dimension_numbers<[1], [0], [0], [1], [0, 0, 1, 1], [], []>} : vector<32x64xbf16>, vector<64x64xbf16>, vector<32x64xf32> -> vector<32x64xf32>
    %c0_43 = arith.constant 0 : index
    %c0_44 = arith.constant 0 : index
    %60 = vector.load %arg14[%c0_43, %c0_44] : memref<1x64xf32, #tpu.memory_space<vmem>>, vector<1x64xf32>
    %61 = vector.broadcast %60 : vector<1x64xf32> to vector<32x64xf32>
    %62 = arith.addf %59, %61 : vector<32x64xf32>
    %c0_45 = arith.constant 0 : index
    %c0_46 = arith.constant 0 : index
    %63 = vector.load %arg2[%c0_45, %c0_46] : memref<32x2xf32, #tpu.memory_space<vmem>>, vector<32x2xf32>
    %64 = vector.extract_strided_slice %63 {offsets = [0, 0], sizes = [32, 1], strides = [1, 1]} : vector<32x2xf32> to vector<32x1xf32>
    %65 = vector.broadcast %64 : vector<32x1xf32> to vector<32x64xf32>
    %66 = arith.addf %62, %65 : vector<32x64xf32>
    %cst_47 = arith.constant dense<0xFF800000> : vector<64xf32>
    %67 = vector.multi_reduction <maximumf>, %66, %cst_47 [0] : vector<32x64xf32> to vector<64xf32>
    %68 = vector.shape_cast %67 : vector<64xf32> to vector<1x64xf32>
    %69 = vector.extract_strided_slice %63 {offsets = [0, 1], sizes = [32, 1], strides = [1, 1]} : vector<32x2xf32> to vector<32x1xf32>
    %70 = vector.broadcast %69 : vector<32x1xf32> to vector<32x64xf32>
    %71 = arith.addf %62, %70 : vector<32x64xf32>
    %cst_48 = arith.constant dense<0xFF800000> : vector<64xf32>
    %72 = vector.multi_reduction <maximumf>, %71, %cst_48 [0] : vector<32x64xf32> to vector<64xf32>
    %73 = vector.shape_cast %72 : vector<64xf32> to vector<1x64xf32>
    %74 = tpu.concatenate %68, %73 in 0 : vector<1x64xf32>, vector<1x64xf32> -> vector<2x64xf32>
    %75 = arith.truncf %74 : vector<2x64xf32> to vector<2x64xbf16>
    %c0_49 = arith.constant 0 : index
    %c0_50 = arith.constant 0 : index
    %76 = vector.load %arg15[%c0_49, %c0_50] : memref<64x32xbf16, #tpu.memory_space<vmem>>, vector<64x32xbf16>
    %cst_51 = arith.constant dense<0.000000e+00> : vector<2x32xf32>
    %77 = tpu.matmul %75, %76, %cst_51 {dimension_numbers = #tpu.dot_dimension_numbers<[1], [0], [0], [1], [0, 0, 1, 1], [], []>} : vector<2x64xbf16>, vector<64x32xbf16>, vector<2x32xf32> -> vector<2x32xf32>
    %c0_52 = arith.constant 0 : index
    %c0_53 = arith.constant 0 : index
    %78 = vector.load %arg16[%c0_52, %c0_53] : memref<1x32xf32, #tpu.memory_space<vmem>>, vector<1x32xf32>
    %79 = vector.broadcast %78 : vector<1x32xf32> to vector<2x32xf32>
    %80 = arith.addf %77, %79 : vector<2x32xf32>
    %cst_54 = arith.constant 0.000000e+00 : f32
    %81 = vector.broadcast %cst_54 : f32 to vector<2x32xf32>
    %82 = arith.maximumf %80, %81 : vector<2x32xf32>
    %83 = arith.truncf %82 : vector<2x32xf32> to vector<2x32xbf16>
    %c0_55 = arith.constant 0 : index
    %c0_56 = arith.constant 0 : index
    %84 = vector.load %arg17[%c0_55, %c0_56] : memref<32x16xbf16, #tpu.memory_space<vmem>>, vector<32x16xbf16>
    %cst_57 = arith.constant dense<0.000000e+00> : vector<2x16xf32>
    %85 = tpu.matmul %83, %84, %cst_57 {dimension_numbers = #tpu.dot_dimension_numbers<[1], [0], [0], [1], [0, 0, 1, 1], [], []>} : vector<2x32xbf16>, vector<32x16xbf16>, vector<2x16xf32> -> vector<2x16xf32>
    %c0_58 = arith.constant 0 : index
    %c0_59 = arith.constant 0 : index
    %86 = vector.load %arg18[%c0_58, %c0_59] : memref<1x16xf32, #tpu.memory_space<vmem>>, vector<1x16xf32>
    %87 = vector.broadcast %86 : vector<1x16xf32> to vector<2x16xf32>
    %88 = arith.addf %85, %87 : vector<2x16xf32>
    %cst_60 = arith.constant 0.000000e+00 : f32
    %89 = vector.broadcast %cst_60 : f32 to vector<2x16xf32>
    %90 = arith.maximumf %88, %89 : vector<2x16xf32>
    %91 = arith.truncf %90 : vector<2x16xf32> to vector<2x16xbf16>
    %c0_61 = arith.constant 0 : index
    %c0_62 = arith.constant 0 : index
    %92 = vector.load %arg19[%c0_61, %c0_62] : memref<16x2xbf16, #tpu.memory_space<vmem>>, vector<16x2xbf16>
    %cst_63 = arith.constant dense<0.000000e+00> : vector<2x2xf32>
    %93 = tpu.matmul %91, %92, %cst_63 {dimension_numbers = #tpu.dot_dimension_numbers<[1], [0], [0], [1], [0, 0, 1, 1], [], []>} : vector<2x16xbf16>, vector<16x2xbf16>, vector<2x2xf32> -> vector<2x2xf32>
    %c0_64 = arith.constant 0 : index
    %c0_65 = arith.constant 0 : index
    %94 = vector.load %arg20[%c0_64, %c0_65] : memref<1x2xf32, #tpu.memory_space<vmem>>, vector<1x2xf32>
    %95 = vector.broadcast %94 : vector<1x2xf32> to vector<2x2xf32>
    %96 = arith.addf %93, %95 : vector<2x2xf32>
    %c0_66 = arith.constant 0 : index
    %c0_67 = arith.constant 0 : index
    %97 = vector.load %arg21[%c0_66, %c0_67] : memref<2x2xf32, #tpu.memory_space<vmem>>, vector<2x2xf32>
    tpu.vector_store %arg21[%c0_66, %c0_67], %96 {strides = array<i32>} : memref<2x2xf32, #tpu.memory_space<vmem>>, vector<2x2xf32>,
    return
  }
}

</mosaic_0001>

<bundles_post_ra>
// kernel: tpu_custom_call.1
= control target key start
LH: loop header
LB: loop body
LE: loop exit
PB: predicated region body
PF: predicated region fallthrough
CT: control target
= control target key end

     0   :  { %s2200_s0 = inlined_call_operand.vmem [shape: bf16[32,32], index: 0, kind: input, shape index: {}]   ;;  %s2201_s1 = inlined_call_operand.vmem [shape: bf16[32,16], index: 1, kind: input, shape index: {}]   ;;  %s2202_s2 = inlined_call_operand.vmem [shape: f32[32,2], index: 2, kind: input, shape index: {}]   ;;  %s2203_s3 = inlined_call_operand.vmem [shape: bf16[16,128], index: 3, kind: input, shape index: {}]   ;;  %s2204_s4 = inlined_call_operand.vmem [shape: f32[1,128], index: 4, kind: input, shape index: {}]   ;;  %s2205_s5 = inlined_call_operand.vmem [shape: bf16[128,64], index: 5, kind: input, shape index: {}]   ;;  %s2206_s6 = inlined_call_operand.vmem [shape: f32[1,64], index: 6, kind: input, shape index: {}]   ;;  %s2207_s7 = inlined_call_operand.vmem [shape: bf16[64,64], index: 7, kind: input, shape index: {}]   ;;  %s2208_s8 = inlined_call_operand.vmem [shape: f32[1,64], index: 8, kind: input, shape index: {}]   ;;  %s2209_s9 = inlined_call_operand.vmem [shape: bf16[64,64], index: 9, kind: input, shape index: {}]   ;;  %s2210_s10 = inlined_call_operand.vmem [shape: f32[1,64], index: 10, kind: input, shape index: {}]   ;;  %s2211_s11 = inlined_call_operand.vmem [shape: bf16[64,64], index: 11, kind: input, shape index: {}]   ;;  %s2212_s12 = inlined_call_operand.vmem [shape: f32[1,64], index: 12, kind: input, shape index: {}]   ;;  %s2213_s13 = inlined_call_operand.vmem [shape: bf16[64,64], index: 13, kind: input, shape index: {}]   ;;  %s2214_s14 = inlined_call_operand.vmem [shape: f32[1,64], index: 14, kind: input, shape index: {}]   ;;  %s2215_s15 = inlined_call_operand.vmem [shape: bf16[64,32], index: 15, kind: input, shape index: {}]   ;;  %s2216_s16 = inlined_call_operand.vmem [shape: f32[1,32], index: 16, kind: input, shape index: {}]   ;;  %s2217_s17 = inlined_call_operand.vmem [shape: bf16[32,16], index: 17, kind: input, shape index: {}]   ;;  %s2218_s18 = inlined_call_operand.vmem [shape: f32[1,16], index: 18, kind: input, shape index: {}]   ;;  %s2219_s19 = inlined_call_operand.vmem [shape: bf16[16,2], index: 19, kind: input, shape index: {}]   ;;  %s2220_s20 = inlined_call_operand.vmem [shape: f32[1,2], index: 20, kind: input, shape index: {}]   ;;  %s2221_s21 = inlined_call_operand.hbm [shape: f32[2,2], index: 21, kind: output, shape index: {}]  }
   0x1   :  { %2226 = sst [smem:[#allocation5_spill]] %s2200_s0 }
   0x2   :  { %2227 = sst [smem:[#allocation6_spill]] %s2201_s1 }
   0x3   :  { %2228 = sst [smem:[#allocation7_spill]] %s2202_s2 }
   0x4   :  { %2229 = sst [smem:[#allocation8_spill]] %s2203_s3 }
   0x5   :  { %2230 = sst [smem:[#allocation9_spill]] %s2204_s4 }
   0x6   :  { %2231 = sst [smem:[#allocation10_spill]] %s2205_s5 }
   0x7   :  { %s2232_s26 = sld [smem:[#allocation6_spill]]  ;;  %vm100_vm0 = vcmask 261120  }
   0x8   :  { %s2233_s0 = sld [smem:[#allocation5_spill]] }
   0xd   :  { %v1803_v0 = vld [vmem:[%s2232_s26 + $0x8] sm:$0xff]   ;;  %v1804_v1 = vld [vmem:[%s2232_s26] sm:$0xff]  }
   0xe   :  { %1622 = vmatprep.subr.bf16.mxu0 %v1803_v0  ;;  %v1985_v2 = vld [vmem:[%s2233_s0] sm:$0xff]   ;;  %v1992_v3 = vld [vmem:[%s2233_s0 + $0x8] sm:$0xff]  }
   0xf   :  { %1623 = vmatpush3.bf16.msra.mxu0 %v1803_v0  ;;  %1626 = vmatprep.mubr.msk.bf16.mxu0 %vm100_vm0, %v1985_v2 }
  0x10   :  { %1624 = vmatprep.subr.bf16.mxu0 %v1804_v1 }
  0x13   :  { %1625 = vmatpush3.bf16.msra.mxu0 %v1804_v1 }
  0x16   :  { %1627 = vmatmul.mubr.msk.bf16.vlgmr.msra.gmra.mxu0 %vm100_vm0, %v1992_v3 }
  0x17   :  { %1660 = vmatprep.mubr.msk.bf16.mxu0 %vm100_vm0, %v1985_v2 }
  0x18   :  { %26 = vsyncpa [#allocation3], 0  ;;  %s2234_s23 = sld [smem:[#allocation8_spill]]  ;;  %vm173_vm1 = vcmask 130048   ;;  %v1816_v40 = vld [vmem:[%s2207_s7 + $0x18] sm:$0xff]   ;;  %v1817_v41 = vld [vmem:[%s2207_s7 + $0x10] sm:$0xff]  }
  0x19   :  { %s2235_s2 = sld [smem:[#allocation10_spill]]  ;;  %v1818_v42 = vld [vmem:[%s2207_s7 + $0x8] sm:$0xff]   ;;  %v1819_v43 = vld [vmem:[%s2207_s7] sm:$0xff]   ;;  %vm440_vm2 = vcmask 523264   ;;  %v1820_v55 = vld [vmem:[%s2209_s9 + $0x18] sm:$0xff]   ;;  %vm1864_vm3 = vmmov 0  }
  0x1a   :  { %s2236_s27 = sld [smem:[#allocation9_spill]]  ;;  %v1481_v47 = vld [vmem:[%s2206_s6] ss:$0 sm:$0xff]  ;;  %v1821_v62 = vld [vmem:[%s2209_s9 + $0x10] sm:$0xff]   ;;  %v1822_v63 = vld [vmem:[%s2209_s9 + $0x8] sm:$0xff]   ;;  %vm1234_vm4 = vcmask 1040384  }
  0x1b   :  { %v1823_v0 = vld [vmem:[%s2209_s9] sm:$0xff]   ;;  %s1865_s29 = smov [#allocation2]   ;;  %vm1447_vm5 = vcmask 9216  }
  0x1e   :  { %v1807_v4 = vld [vmem:[%s2234_s23] sm:$0xff]  }
  0x1f   :  { %1630 = vmatprep.subr.bf16.mxu1 %v1807_v4  ;;  %v1808_v5 = vld [vmem:[%s2235_s2 + $0x38] sm:$0xff]   ;;  %v1809_v12 = vld [vmem:[%s2235_s2 + $0x30] sm:$0xff]   ;;  %v1810_v13 = vld [vmem:[%s2235_s2 + $0x28] sm:$0xff]  }
  0x20   :  { %1631 = vmatpush3.bf16.msra.mxu1 %v1807_v4  ;;  %v1811_v14 = vld [vmem:[%s2235_s2 + $0x20] sm:$0xff]   ;;  %v1812_v15 = vld [vmem:[%s2235_s2 + $0x18] sm:$0xff]   ;;  %v1813_v16 = vld [vmem:[%s2235_s2 + $0x10] sm:$0xff]  }
  0x21   :  { %1636 = vmatprep.subr.bf16.mxu1 %v1808_v5  ;;  %v1814_v17 = vld [vmem:[%s2235_s2 + $0x8] sm:$0xff]   ;;  %v1815_v18 = vld [vmem:[%s2235_s2] sm:$0xff]  }
  0x22   :  { %v1469_v21 = vld [vmem:[%s2236_s27] ss:$0 sm:$0xff] }
  0xd6   :  { %v1628_v6 = vpop.f32.mrf.mxu0 }
  0xd8   :  { %v141_v7 = vpop.f32.mrf.mxu0 }
  0xda   :  { %v1629_v8 = vpop.f32.mrf.mxu0 }
  0xdb   :  { %v157_v11 = vpack.c.bf16 %v1629_v8, %v1628_v6 }
  0xdc   :  { %v144_v9 = vpop.f32.mrf.mxu0 }
  0xdd   :  { %v156_v10 = vpack.c.bf16 %v144_v9, %v141_v7 }
  0xdf   :  { %1632 = vmatprep.mubr.msk.bf16.mxu1 %vm173_vm1, %v156_v10 }
  0xe0   :  { %1633 = vmatmul.mubr.msk.bf16.vlgmr.msra.gmra.mxu1 %vm173_vm1, %v157_v11 }
  0xe1   :  { %1637 = vmatpush3.bf16.msra.mxu1 %v1808_v5  ;;  %v1490_v5 = vld [vmem:[%s2208_s8] ss:$0 sm:$0xff]  ;;  %s2237_s8 = sld [smem:[#allocation7_spill]] }
  0xe2   :  { %1638 = vmatprep.subr.bf16.mxu1 %v1809_v12 }
  0xe5   :  { %1639 = vmatpush3.bf16.msra.mxu1 %v1809_v12 }
  0xe6   :  { %1640 = vmatprep.subr.bf16.mxu1 %v1810_v13 }
  0xe9   :  { %1641 = vmatpush3.bf16.msra.mxu1 %v1810_v13 }
  0xea   :  { %1642 = vmatprep.subr.bf16.mxu1 %v1811_v14 }
  0xed   :  { %1643 = vmatpush3.bf16.msra.mxu1 %v1811_v14 }
  0xee   :  { %1644 = vmatprep.subr.bf16.mxu1 %v1812_v15 }
  0xf1   :  { %1645 = vmatpush3.bf16.msra.mxu1 %v1812_v15 }
  0xf2   :  { %1646 = vmatprep.subr.bf16.mxu1 %v1813_v16 }
  0xf5   :  { %1647 = vmatpush3.bf16.msra.mxu1 %v1813_v16 }
  0xf6   :  { %1648 = vmatprep.subr.bf16.mxu1 %v1814_v17 }
  0xf9   :  { %1649 = vmatpush3.bf16.msra.mxu1 %v1814_v17 }
  0xfa   :  { %1650 = vmatprep.subr.bf16.mxu1 %v1815_v18 }
  0xfd   :  { %1651 = vmatpush3.bf16.msra.mxu1 %v1815_v18 }
  0xfe   :  { %1684 = vmatprep.subr.bf16.mxu1 %v1820_v55 }
 0x1a0   :  { %v1634_v19 = vpop.f32.mrf.mxu1 }
 0x1a1   :  { %v223_v25 = vadd.f32 %v1634_v19, %v1469_v21 }
 0x1a2   :  { %v214_v20 = vpop.f32.mrf.mxu1 }
 0x1a3   :  { %v215_v23 = vadd.f32 %v1469_v21, %v214_v20  ;;  %v231_v31 = vmax.f32 %v223_v25, 0.0  ;;  %v1825_v25 = vld [vmem:[%s2211_s11 + $0x10] sm:$0xff]  }
 0x1a4   :  { %v1635_v22 = vpop.f32.mrf.mxu1 }
 0x1a5   :  { %v226_v24 = vadd.f32 %v1635_v22, %v1469_v21  ;;  %v229_v29 = vmax.f32 %v215_v23, 0.0 }
 0x1a6   :  { %v217_v26 = vpop.f32.mrf.mxu1 }
 0x1a7   :  { %v218_v27 = vadd.f32 %v1469_v21, %v217_v26  ;;  %v232_v28 = vmax.f32 %v226_v24, 0.0  ;;  %v1824_v24 = vld [vmem:[%s2211_s11 + $0x18] sm:$0xff]   ;;  %v1826_v26 = vld [vmem:[%s2211_s11 + $0x8] sm:$0xff]  }
 0x1a9   :  { %v230_v30 = vmax.f32 %v218_v27, 0.0  ;;  %v234_v33 = vpack.c.bf16 %v232_v28, %v231_v31  ;;  %v1827_v27 = vld [vmem:[%s2211_s11] sm:$0xff]  }
 0x1ab   :  { %v233_v32 = vpack.c.bf16 %v230_v30, %v229_v29  ;;  %v1499_v30 = vld [vmem:[%s2210_s10] ss:$0 sm:$0xff] }
 0x1ad   :  { %1652 = vmatprep.mubr.bf16.mxu1 %v233_v32 }
 0x1ae   :  { %1653 = vmatmul.mubr.bf16.vlgmr.msra.gmra.mxu1 %v234_v33 }
 0x1af   :  { %1685 = vmatpush3.bf16.msra.mxu1 %v1820_v55 }
 0x1b0   :  { %1686 = vmatprep.subr.bf16.mxu1 %v1821_v62 }
 0x1b3   :  { %1687 = vmatpush3.bf16.msra.mxu1 %v1821_v62 }
 0x1b4   :  { %1688 = vmatprep.subr.bf16.mxu1 %v1822_v63 }
 0x1b7   :  { %1689 = vmatpush3.bf16.msra.mxu1 %v1822_v63 }
 0x1b8   :  { %1690 = vmatprep.subr.bf16.mxu1 %v1823_v0 }
 0x1bb   :  { %1691 = vmatpush3.bf16.msra.mxu1 %v1823_v0 }
 0x26e   :  { %v1654_v34 = vpop.f32.mrf.mxu1 }
 0x270   :  { %v333_v35 = vpop.f32.mrf.mxu1 }
 0x272   :  { %v1655_v36 = vpop.f32.mrf.mxu1 }
 0x273   :  { %v349_v37 = vpack.c.bf16 %v1655_v36, %v1654_v34 }
 0x274   :  { %v336_v38 = vpop.f32.mrf.mxu1 }
 0x275   :  { %v348_v39 = vpack.c.bf16 %v336_v38, %v333_v35  ;;  %1656 = vmatprep.subr.bf16.mxu0 %v349_v37 }
 0x276   :  { %1657 = vmatpush3.bf16.msra.mxu0 %v349_v37 }
 0x277   :  { %1658 = vmatprep.subr.bf16.mxu0 %v348_v39 }
 0x27a   :  { %1659 = vmatpush3.bf16.msra.mxu0 %v348_v39 }
 0x27b   :  { %1664 = vmatprep.subr.bf16.mxu0 %v1816_v40 }
 0x27d   :  { %1661 = vmatmul.mubr.msk.bf16.vlgmr.msra.gmra.mxu0 %vm100_vm0, %v1992_v3 }
 0x27e   :  { %1665 = vmatpush3.bf16.msra.mxu0 %v1816_v40 }
 0x27f   :  { %1666 = vmatprep.subr.bf16.mxu0 %v1817_v41 }
 0x282   :  { %1667 = vmatpush3.bf16.msra.mxu0 %v1817_v41 }
 0x283   :  { %1668 = vmatprep.subr.bf16.mxu0 %v1818_v42 }
 0x286   :  { %1669 = vmatpush3.bf16.msra.mxu0 %v1818_v42 }
 0x287   :  { %1670 = vmatprep.subr.bf16.mxu0 %v1819_v43 }
 0x28a   :  { %1671 = vmatpush3.bf16.msra.mxu0 %v1819_v43 }
 0x33d   :  { %v1662_v44 = vpop.f32.mrf.mxu0 }
 0x33e   :  { %v400_v52 = vadd.f32 %v1662_v44, %v1481_v47 }
 0x33f   :  { %v391_v45 = vpop.f32.mrf.mxu0 }
 0x340   :  { %v392_v50 = vadd.f32 %v1481_v47, %v391_v45 }
 0x341   :  { %v1663_v46 = vpop.f32.mrf.mxu0 }
 0x342   :  { %v403_v48 = vadd.f32 %v1663_v46, %v1481_v47 }
 0x343   :  { %v394_v49 = vpop.f32.mrf.mxu0 }
 0x344   :  { %v395_v51 = vadd.f32 %v1481_v47, %v394_v49  ;;  %v407_v54 = vpack.c.bf16 %v403_v48, %v400_v52 }
 0x346   :  { %v406_v53 = vpack.c.bf16 %v395_v51, %v392_v50  ;;  %v1508_v50 = vld [vmem:[%s2212_s12] ss:$0 sm:$0xff] }
 0x348   :  { %1672 = vmatprep.mubr.msk.bf16.mxu0 %vm440_vm2, %v406_v53 }
 0x349   :  { %1673 = vmatmul.mubr.msk.bf16.vlgmr.msra.gmra.mxu0 %vm440_vm2, %v407_v54 }
 0x34a   :  { %1680 = vmatprep.mubr.msk.bf16.mxu0 %vm100_vm0, %v1985_v2 }
 0x409   :  { %v1674_v56 = vpop.f32.mrf.mxu0 }
 0x40b   :  { %v481_v57 = vpop.f32.mrf.mxu0 }
 0x40d   :  { %v1675_v58 = vpop.f32.mrf.mxu0 }
 0x40e   :  { %v497_v59 = vpack.c.bf16 %v1675_v58, %v1674_v56 }
 0x40f   :  { %v484_v60 = vpop.f32.mrf.mxu0 }
 0x410   :  { %v496_v61 = vpack.c.bf16 %v484_v60, %v481_v57  ;;  %1676 = vmatprep.subr.bf16.mxu0 %v497_v59 }
 0x411   :  { %1677 = vmatpush3.bf16.msra.mxu0 %v497_v59 }
 0x412   :  { %1678 = vmatprep.subr.bf16.mxu0 %v496_v61 }
 0x415   :  { %1679 = vmatpush3.bf16.msra.mxu0 %v496_v61 }
 0x418   :  { %1681 = vmatmul.mubr.msk.bf16.vlgmr.msra.gmra.mxu0 %vm100_vm0, %v1992_v3 }
 0x419   :  { %1700 = vmatprep.mubr.msk.bf16.mxu0 %vm100_vm0, %v1985_v2 }
 0x4d8   :  { %v1682_v1 = vpop.f32.mrf.mxu0 }
 0x4d9   :  { %v548_v9 = vadd.f32 %v1682_v1, %v1490_v5 }
 0x4da   :  { %v539_v4 = vpop.f32.mrf.mxu0 }
 0x4db   :  { %v540_v7 = vadd.f32 %v1490_v5, %v539_v4  ;;  %v556_v15 = vmax.f32 %v548_v9, 0.0 }
 0x4dc   :  { %v1683_v6 = vpop.f32.mrf.mxu0 }
 0x4dd   :  { %v551_v8 = vadd.f32 %v1683_v6, %v1490_v5  ;;  %v554_v13 = vmax.f32 %v540_v7, 0.0 }
 0x4de   :  { %v542_v10 = vpop.f32.mrf.mxu0 }
 0x4df   :  { %v543_v11 = vadd.f32 %v1490_v5, %v542_v10  ;;  %v557_v12 = vmax.f32 %v551_v8, 0.0 }
 0x4e1   :  { %v555_v14 = vmax.f32 %v543_v11, 0.0  ;;  %v559_v17 = vpack.c.bf16 %v557_v12, %v556_v15 }
 0x4e3   :  { %v558_v16 = vpack.c.bf16 %v555_v14, %v554_v13  ;;  %v1828_v14 = vld [vmem:[%s2213_s13 + $0x18] sm:$0xff]  }
 0x4e5   :  { %1692 = vmatprep.mubr.msk.bf16.mxu1 %vm440_vm2, %v558_v16 }
 0x4e6   :  { %1693 = vmatmul.mubr.msk.bf16.vlgmr.msra.gmra.mxu1 %vm440_vm2, %v559_v17 }
 0x4e7   :  { %1720 = vmatprep.mubr.msk.bf16.mxu1 %vm100_vm0, %v1985_v2 }
 0x5a6   :  { %v1694_v18 = vpop.f32.mrf.mxu1 }
 0x5a8   :  { %v632_v19 = vpop.f32.mrf.mxu1 }
 0x5aa   :  { %v1695_v20 = vpop.f32.mrf.mxu1 }
 0x5ab   :  { %v648_v21 = vpack.c.bf16 %v1695_v20, %v1694_v18 }
 0x5ac   :  { %v635_v22 = vpop.f32.mrf.mxu1 }
 0x5ad   :  { %v647_v23 = vpack.c.bf16 %v635_v22, %v632_v19  ;;  %1696 = vmatprep.subr.bf16.mxu0 %v648_v21  ;;  %v1831_v22 = vld [vmem:[%s2213_s13] sm:$0xff]  }
 0x5ae   :  { %1697 = vmatpush3.bf16.msra.mxu0 %v648_v21  ;;  %v1830_v21 = vld [vmem:[%s2213_s13 + $0x8] sm:$0xff]  }
 0x5af   :  { %1698 = vmatprep.subr.bf16.mxu0 %v647_v23 }
 0x5b2   :  { %1699 = vmatpush3.bf16.msra.mxu0 %v647_v23  ;;  %v1162_v23 = vld [vmem:[%s2237_s8 + $0x10] sm:$0xff] }
 0x5b3   :  { %1704 = vmatprep.subr.bf16.mxu0 %v1824_v24 }
 0x5b5   :  { %1701 = vmatmul.mubr.msk.bf16.vlgmr.msra.gmra.mxu0 %vm100_vm0, %v1992_v3 }
 0x5b6   :  { %1705 = vmatpush3.bf16.msra.mxu0 %v1824_v24  ;;  %v1861_v24 = vmov 0  }
 0x5b7   :  { %1706 = vmatprep.subr.bf16.mxu0 %v1825_v25  ;;  %1800 = vset.pattern.permute.xlu1 %v1861_v24 }
 0x5b8   :  { %1799 = vset.pattern.permute.xlu0 %v1861_v24  ;;  %1176 = vperm.xlu1 %1800, %v1162_v23  }
 0x5ba   :  { %1707 = vmatpush3.bf16.msra.mxu0 %v1825_v25  ;;  %v1163_v25 = vld [vmem:[%s2237_s8 + $0x18] sm:$0xff] }
 0x5bb   :  { %1708 = vmatprep.subr.bf16.mxu0 %v1826_v26 }
 0x5bc   :  { %1181 = vperm.xlu1 %1800, %v1163_v25  }
 0x5be   :  { %1709 = vmatpush3.bf16.msra.mxu0 %v1826_v26  ;;  %v1161_v26 = vld [vmem:[%s2237_s8 + $0x8] sm:$0xff] }
 0x5bf   :  { %1710 = vmatprep.subr.bf16.mxu0 %v1827_v27 }
 0x5c2   :  { %1711 = vmatpush3.bf16.msra.mxu0 %v1827_v27  ;;  %v1862_v27 = vmov 1  }
 0x5c3   :  { %1802 = vset.pattern.permute.xlu1 %v1862_v27 }
 0x5c4   :  { %1206 = vperm.xlu1 %1802, %v1161_v26  }
 0x5c8   :  { %1210 = vperm.xlu1 %1802, %v1162_v23  }
 0x675   :  { %v1702_v28 = vpop.f32.mrf.mxu0 }
 0x676   :  { %v699_v34 = vadd.f32 %v1702_v28, %v1499_v30 }
 0x677   :  { %v690_v29 = vpop.f32.mrf.mxu0 }
 0x678   :  { %v691_v32 = vadd.f32 %v1499_v30, %v690_v29  ;;  %v707_v40 = vmax.f32 %v699_v34, 0.0  ;;  %v1832_v34 = vld [vmem:[%s2215_s15 + $0x18] sm:$0xff]  }
 0x679   :  { %v1703_v31 = vpop.f32.mrf.mxu0 }
 0x67a   :  { %v702_v33 = vadd.f32 %v1703_v31, %v1499_v30  ;;  %v705_v38 = vmax.f32 %v691_v32, 0.0 }
 0x67b   :  { %v693_v35 = vpop.f32.mrf.mxu0 }
 0x67c   :  { %v694_v36 = vadd.f32 %v1499_v30, %v693_v35  ;;  %v708_v37 = vmax.f32 %v702_v33, 0.0  ;;  %v1863_v35 = vmov 0.0  }
 0x67e   :  { %v706_v39 = vmax.f32 %v694_v36, 0.0  ;;  %v710_v42 = vpack.c.bf16 %v708_v37, %v707_v40  ;;  %v1833_v36 = vld [vmem:[%s2215_s15 + $0x10] sm:$0xff]   ;;  %v1834_v37 = vld [vmem:[%s2215_s15 + $0x8] sm:$0xff]  }
 0x680   :  { %v709_v41 = vpack.c.bf16 %v706_v39, %v705_v38  ;;  %v1835_v38 = vld [vmem:[%s2215_s15] sm:$0xff]   ;;  %v1177_v39 = vpop.permute.xlu1 %1176 }
 0x682   :  { %1712 = vmatprep.mubr.msk.bf16.mxu0 %vm440_vm2, %v709_v41 }
 0x683   :  { %1713 = vmatmul.mubr.msk.bf16.vlgmr.msra.gmra.mxu0 %vm440_vm2, %v710_v42 }
 0x684   :  { %1736 = vmatprep.mubr.msk.bf16.mxu0 %vm100_vm0, %v1985_v2  ;;  %v1182_v41 = vpop.permute.xlu1 %1181 }
 0x743   :  { %v1714_v43 = vpop.f32.mrf.mxu0 }
 0x745   :  { %v783_v44 = vpop.f32.mrf.mxu0 }
 0x747   :  { %v1715_v45 = vpop.f32.mrf.mxu0 }
 0x748   :  { %v799_v46 = vpack.c.bf16 %v1715_v45, %v1714_v43  ;;  %v1207_v43 = vpop.permute.xlu1 %1206 }
 0x749   :  { %v786_v47 = vpop.f32.mrf.mxu0 }
 0x74a   :  { %v798_v48 = vpack.c.bf16 %v786_v47, %v783_v44  ;;  %1716 = vmatprep.subr.bf16.mxu1 %v799_v46  ;;  %v1519_v44 = vld [vmem:[%s2214_s14] ss:$0 sm:$0xff] }
 0x74b   :  { %1717 = vmatpush3.bf16.msra.mxu1 %v799_v46 }
 0x74c   :  { %1718 = vmatprep.subr.bf16.mxu1 %v798_v48 }
 0x74f   :  { %1719 = vmatpush3.bf16.msra.mxu1 %v798_v48 }
 0x752   :  { %1721 = vmatmul.mubr.msk.bf16.vlgmr.msra.gmra.mxu1 %vm100_vm0, %v1992_v3 }
 0x753   :  { %1728 = vmatprep.mubr.msk.bf16.mxu1 %vm100_vm0, %v1985_v2 }
 0x812   :  { %v1722_v49 = vpop.f32.mrf.mxu1 }
 0x813   :  { %v850_v52 = vadd.f32 %v1722_v49, %v1508_v50  ;;  %v1211_v49 = vpop.permute.xlu1 %1210 }
 0x814   :  { %v841_v51 = vpop.f32.mrf.mxu1 }
 0x815   :  { %v842_v54 = vadd.f32 %v1508_v50, %v841_v51  ;;  %v858_v57 = vmax.f32 %v850_v52, 0.0 }
 0x816   :  { %v1723_v53 = vpop.f32.mrf.mxu1 }
 0x817   :  { %v853_v55 = vadd.f32 %v1723_v53, %v1508_v50  ;;  %v856_v60 = vmax.f32 %v842_v54, 0.0 }
 0x818   :  { %v844_v56 = vpop.f32.mrf.mxu1 }
 0x819   :  { %v859_v58 = vmax.f32 %v853_v55, 0.0  ;;  %v845_v59 = vadd.f32 %v1508_v50, %v844_v56 }
 0x81b   :  { %v861_v61 = vpack.c.bf16 %v859_v58, %v858_v57  ;;  %v857_v62 = vmax.f32 %v845_v59, 0.0 }
 0x81d   :  { %v860_v63 = vpack.c.bf16 %v857_v62, %v856_v60  ;;  %1724 = vmatprep.subr.bf16.mxu1 %v861_v61 }
 0x81e   :  { %1725 = vmatpush3.bf16.msra.mxu1 %v861_v61 }
 0x81f   :  { %1726 = vmatprep.subr.bf16.mxu1 %v860_v63 }
 0x822   :  { %1727 = vmatpush3.bf16.msra.mxu1 %v860_v63 }
 0x825   :  { %1729 = vmatmul.mubr.msk.bf16.vlgmr.msra.gmra.mxu1 %vm100_vm0, %v1992_v3 }
 0x826   :  { %1744 = vmatprep.mubr.msk.bf16.mxu1 %vm100_vm0, %v1985_v2 }
 0x8e5   :  { %v1730_v0 = vpop.f32.mrf.mxu1 }
 0x8e7   :  { %v896_v1 = vpop.f32.mrf.mxu1 }
 0x8e9   :  { %v1731_v4 = vpop.f32.mrf.mxu1 }
 0x8ea   :  { %v912_v5 = vpack.c.bf16 %v1731_v4, %v1730_v0 }
 0x8eb   :  { %v899_v6 = vpop.f32.mrf.mxu1 }
 0x8ec   :  { %v911_v7 = vpack.c.bf16 %v899_v6, %v896_v1  ;;  %1732 = vmatprep.subr.bf16.mxu0 %v912_v5 }
 0x8ed   :  { %1733 = vmatpush3.bf16.msra.mxu0 %v912_v5 }
 0x8ee   :  { %1734 = vmatprep.subr.bf16.mxu0 %v911_v7 }
 0x8f1   :  { %1735 = vmatpush3.bf16.msra.mxu0 %v911_v7 }
 0x8f4   :  { %1737 = vmatmul.mubr.msk.bf16.vlgmr.msra.gmra.mxu0 %vm100_vm0, %v1992_v3 }
 0x8f5   :  { %1752 = vmatprep.mubr.msk.bf16.mxu0 %vm100_vm0, %v1985_v2  ;;  %v1829_v2 = vld [vmem:[%s2213_s13 + $0x10] sm:$0xff]  }
 0x9b4   :  { %v1738_v8 = vpop.f32.mrf.mxu0 }
 0x9b6   :  { %v947_v9 = vpop.f32.mrf.mxu0 }
 0x9b8   :  { %v1739_v10 = vpop.f32.mrf.mxu0 }
 0x9b9   :  { %v963_v11 = vpack.c.bf16 %v1739_v10, %v1738_v8 }
 0x9ba   :  { %v950_v12 = vpop.f32.mrf.mxu0 }
 0x9bb   :  { %v962_v13 = vpack.c.bf16 %v950_v12, %v947_v9  ;;  %1740 = vmatprep.subr.bf16.mxu1 %v963_v11 }
 0x9bc   :  { %1741 = vmatpush3.bf16.msra.mxu1 %v963_v11 }
 0x9bd   :  { %1742 = vmatprep.subr.bf16.mxu1 %v962_v13 }
 0x9c0   :  { %1743 = vmatpush3.bf16.msra.mxu1 %v962_v13 }
 0x9c1   :  { %1756 = vmatprep.subr.bf16.mxu1 %v1828_v14 }
 0x9c3   :  { %1745 = vmatmul.mubr.msk.bf16.vlgmr.msra.gmra.mxu1 %vm100_vm0, %v1992_v3 }
 0x9c4   :  { %1757 = vmatpush3.bf16.msra.mxu1 %v1828_v14 }
 0x9c5   :  { %1758 = vmatprep.subr.bf16.mxu1 %v1829_v2 }
 0x9c8   :  { %1759 = vmatpush3.bf16.msra.mxu1 %v1829_v2 }
 0x9c9   :  { %1760 = vmatprep.subr.bf16.mxu1 %v1830_v21 }
 0x9cc   :  { %1761 = vmatpush3.bf16.msra.mxu1 %v1830_v21 }
 0x9cd   :  { %1762 = vmatprep.subr.bf16.mxu1 %v1831_v22 }
 0x9d0   :  { %1763 = vmatpush3.bf16.msra.mxu1 %v1831_v22 }
 0x9d1   :  { %1780 = vmatprep.subr.bf16.mxu1 %v1863_v35 }
 0xa83   :  { %v1746_v15 = vpop.f32.mrf.mxu1 }
 0xa85   :  { %v998_v16 = vpop.f32.mrf.mxu1 }
 0xa87   :  { %v1747_v17 = vpop.f32.mrf.mxu1 }
 0xa88   :  { %v1014_v18 = vpack.c.bf16 %v1747_v17, %v1746_v15 }
 0xa89   :  { %v1001_v19 = vpop.f32.mrf.mxu1 }
 0xa8a   :  { %v1013_v20 = vpack.c.bf16 %v1001_v19, %v998_v16  ;;  %1748 = vmatprep.subr.bf16.mxu0 %v1014_v18 }
 0xa8b   :  { %1749 = vmatpush3.bf16.msra.mxu0 %v1014_v18 }
 0xa8c   :  { %1750 = vmatprep.subr.bf16.mxu0 %v1013_v20 }
 0xa8f   :  { %1751 = vmatpush3.bf16.msra.mxu0 %v1013_v20 }
 0xa90   :  { %1768 = vmatprep.subr.bf16.mxu0 %v1863_v35 }
 0xa92   :  { %1753 = vmatmul.mubr.msk.bf16.vlgmr.msra.gmra.mxu0 %vm100_vm0, %v1992_v3  ;;  %v1160_v3 = vld [vmem:[%s2237_s8] sm:$0xff] }
 0xa93   :  { %1166 = vperm.xlu0 %1799, %v1160_v3   ;;  %1769 = vmatpush3.bf16.msra.mxu0 %v1832_v34 }
 0xa94   :  { %1770 = vmatprep.subr.bf16.mxu0 %v1863_v35  ;;  %1776 = vmatprep.mubr.msk.bf16.mxu0 %vm1864_vm3, %v1863_v35 }
 0xa97   :  { %1171 = vperm.xlu0 %1799, %v1161_v26   ;;  %1771 = vmatpush3.bf16.msra.mxu0 %v1833_v36 }
 0xa98   :  { %1772 = vmatprep.subr.bf16.mxu0 %v1863_v35 }
 0xa9b   :  { %1801 = vset.pattern.permute.xlu0 %v1862_v27  ;;  %1773 = vmatpush3.bf16.msra.mxu0 %v1834_v37 }
 0xa9c   :  { %1202 = vperm.xlu0 %1801, %v1160_v3   ;;  %1774 = vmatprep.subr.bf16.mxu0 %v1863_v35 }
 0xa9f   :  { %1775 = vmatpush3.bf16.msra.mxu0 %v1835_v38 }
 0xaa0   :  { %1214 = vperm.xlu0 %1801, %v1163_v25   ;;  %1788 = vmatprep.subr.bf16.mxu0 %v1863_v35 }
 0xb0e   :  { %v1167_v40 = vpop.permute.xlu0 %1166 }
 0xb12   :  { %v1172_v42 = vpop.permute.xlu0 %1171 }
 0xb17   :  { %v1203_v46 = vpop.permute.xlu0 %1202 }
 0xb1b   :  { %v1215_v58 = vpop.permute.xlu0 %1214 }
 0xb52   :  { %v1754_v28 = vpop.f32.mrf.mxu0 }
 0xb54   :  { %v1049_v29 = vpop.f32.mrf.mxu0 }
 0xb56   :  { %v1755_v30 = vpop.f32.mrf.mxu0 }
 0xb57   :  { %v1065_v33 = vpack.c.bf16 %v1755_v30, %v1754_v28  ;;  %v1836_v28 = vld [vmem:[%s2217_s17 + $0x8] sm:$0xff]   ;;  %v1526_v30 = vld [vmem:[%s2216_s16] ss:$0 sm:$0xff] }
 0xb58   :  { %v1052_v31 = vpop.f32.mrf.mxu0 }
 0xb59   :  { %v1064_v32 = vpack.c.bf16 %v1052_v31, %v1049_v29  ;;  %v1837_v29 = vld [vmem:[%s2217_s17] sm:$0xff]  }
 0xb5b   :  { %1764 = vmatprep.mubr.msk.bf16.mxu1 %vm440_vm2, %v1064_v32 }
 0xb5c   :  { %1765 = vmatmul.mubr.msk.bf16.vlgmr.msra.gmra.mxu1 %vm440_vm2, %v1065_v33 }
 0xb5d   :  { %1784 = vmatprep.mubr.msk.bf16.mxu1 %vm1864_vm3, %v1863_v35  ;;  %1781 = vmatpush3.bf16.msra.mxu1 %v1836_v28 }
 0xb5e   :  { %1782 = vmatprep.subr.bf16.mxu1 %v1863_v35 }
 0xb61   :  { %1783 = vmatpush3.bf16.msra.mxu1 %v1837_v29 }
 0xc1c   :  { %v1766_v45 = vpop.f32.mrf.mxu1 }
 0xc1d   :  { %v1154_v47 = vadd.f32 %v1766_v45, %v1519_v44 }
 0xc1e   :  { %v1145_v48 = vpop.f32.mrf.mxu1 }
 0xc1f   :  { %v1146_v50 = vadd.f32 %v1519_v44, %v1145_v48  ;;  %v1186_v52 = vadd.f32 %v1177_v39, %v1154_v47  ;;  %v1219_v53 = vadd.f32 %v1211_v49, %v1154_v47  ;;  %v1532_v39 = vld [vmem:[%s2218_s18] ss:$0 sm:$0xff] }
 0xc20   :  { %v1767_v51 = vpop.f32.mrf.mxu1  ;;  %v1536_v47 = vld [vmem:[%s2220_s20] ss:$0 sm:$0xff] }
 0xc21   :  { %v1157_v54 = vadd.f32 %v1767_v51, %v1519_v44  ;;  %v1184_v56 = vadd.f32 %v1167_v40, %v1146_v50  ;;  %v1217_v57 = vadd.f32 %v1203_v46, %v1146_v50  ;;  %v1190_v0 = vsel %vm440_vm2, %v1186_v52, -inf }
 0xc22   :  { %v1148_v55 = vpop.f32.mrf.mxu1  ;;  %v1223_v1 = vsel %vm440_vm2, %v1219_v53, -inf }
 0xc23   :  { %v1149_v59 = vadd.f32 %v1519_v44, %v1148_v55  ;;  %v1187_v60 = vadd.f32 %v1182_v41, %v1157_v54  ;;  %v1220_v61 = vadd.f32 %v1215_v58, %v1157_v54  ;;  %v1188_v6 = vsel %vm440_vm2, %v1184_v56, -inf }
 0xc24   :  { %v1221_v7 = vsel %vm440_vm2, %v1217_v57, -inf }
 0xc25   :  { %v1185_v62 = vadd.f32 %v1172_v42, %v1149_v59  ;;  %v1218_v63 = vadd.f32 %v1207_v43, %v1149_v59  ;;  %v1191_v4 = vsel %vm440_vm2, %v1187_v60, -inf  ;;  %v1224_v5 = vsel %vm440_vm2, %v1220_v61, -inf }
 0xc26   :  { %v1193_v10 = vmax.f32 %v1190_v0, %v1191_v4  ;;  %v1226_v11 = vmax.f32 %v1223_v1, %v1224_v5 }
 0xc27   :  { %v1189_v8 = vsel %vm440_vm2, %v1185_v62, -inf  ;;  %v1222_v9 = vsel %vm440_vm2, %v1218_v63, -inf }
 0xc28   :  { %v1192_v12 = vmax.f32 %v1188_v6, %v1189_v8  ;;  %v1225_v13 = vmax.f32 %v1221_v7, %v1222_v9 }
 0xc2a   :  { %v1194_v14 = vmax.f32 %v1192_v12, %v1193_v10  ;;  %v1227_v2 = vmax.f32 %v1225_v13, %v1226_v11 }
 0xc2c   :  { %v1195_v15 = vrot.slane %v1194_v14, 4  ;;  %v1228_v16 = vrot.slane %v1227_v2, 4 }
 0xc2e   :  { %v1196_v17 = vmax.f32 %v1194_v14, %v1195_v15  ;;  %v1229_v18 = vmax.f32 %v1227_v2, %v1228_v16 }
 0xc30   :  { %v1197_v19 = vrot.slane %v1196_v17, 2  ;;  %v1230_v20 = vrot.slane %v1229_v18, 2 }
 0xc32   :  { %v1198_v21 = vmax.f32 %v1196_v17, %v1197_v19  ;;  %v1231_v22 = vmax.f32 %v1229_v18, %v1230_v20 }
 0xc34   :  { %v1199_v23 = vrot.slane %v1198_v21, 1  ;;  %v1232_v3 = vrot.slane %v1231_v22, 1 }
 0xc36   :  { %v1200_v24 = vmax.f32 %v1198_v21, %v1199_v23  ;;  %v1233_v25 = vmax.f32 %v1231_v22, %v1232_v3 }
 0xc38   :  { %v1235_v26 = vsel %vm1234_vm4, %v1200_v24, %v1233_v25 }
 0xc39   :  { %v1236_v27 = vpack.c.bf16 %v1235_v26, %v1235_v26 }
 0xc3b   :  { %1777 = vmatmul.mubr.msk.bf16.vlgmr.msra.gmra.mxu0 %vm440_vm2, %v1236_v27 }
 0xc3c   :  { %1790 = vmatprep.mubr.msk.bf16.mxu0 %vm1864_vm3, %v1863_v35  ;;  %v1838_v35 = vld [vmem:[%s2219_s19] sm:$0xff]   ;;  %s1455_s19 = sshll.u32 %s1865_s29, 4  ;;  %s1456_s19 = int_to_ptr.vmem [resolvable:$true] %s1455_s19 }
 0xc3d   :  { %1789 = vmatpush3.bf16.msra.mxu0 %v1838_v35  ;;  %s1839_s18 = scalar_lea.vmem %s1456_s19, 32  ;;  %p1844_p1 = scmp.lt.s32.totalorder %s1456_s19, %s1456_s19 }
 0xc3e   :  { %p1840_p0 = scmp.ne.s32.totalorder %s1456_s19, %s1839_s18  ;;  %p1845_p2 = scmp.lt.s32.totalorder %s1839_s18, %s1839_s18 }
 0xc40   :  { %p1846_p3 = por %p1845_p2, %p1844_p1 }
 0xc42   :  { %p1847_p4 = pnand %p1846_p3, %p1840_p0 }
 0xcfb   :  { %v1313_v31 = vpop.f32.mrf.mxu0 }
 0xcfc   :  { %v1314_v32 = vadd.f32 %v1526_v30, %v1313_v31 }
 0xcfd   :  { %v1778_v33 = vpop.f32.mrf.mxu0 }
 0xcfe   :  { %v1319_v34 = vmax.f32 %v1314_v32, 0.0 }
 0xcff   :  { %v1316_v36 = vpop.f32.mrf.mxu0 }
 0xd00   :  { %v1320_v37 = vpack.c.bf16 %v1319_v34, %v1319_v34 }
 0xd01   :  { %v1779_v38 = vpop.f32.mrf.mxu0 }
 0xd02   :  { %1785 = vmatmul.mubr.msk.bf16.vlgmr.msra.gmra.mxu1 %vm100_vm0, %v1320_v37 }
 0xdc2   :  { %v1381_v40 = vpop.f32.mrf.mxu1 }
 0xdc3   :  { %v1382_v41 = vadd.f32 %v1532_v39, %v1381_v40 }
 0xdc4   :  { %v1786_v42 = vpop.f32.mrf.mxu1 }
 0xdc5   :  { %v1387_v43 = vmax.f32 %v1382_v41, 0.0 }
 0xdc6   :  { %v1384_v44 = vpop.f32.mrf.mxu1 }
 0xdc7   :  { %v1388_v45 = vpack.c.bf16 %v1387_v43, %v1387_v43 }
 0xdc8   :  { %v1787_v46 = vpop.f32.mrf.mxu1 }
 0xdc9   :  { %1791 = vmatmul.mubr.msk.bf16.vlgmr.msra.gmra.mxu0 %vm173_vm1, %v1388_v45 }
 0xe89   :  { %v1441_v48 = vpop.f32.mrf.mxu0 }
 0xe8a   :  { %v1442_v49 = vadd.f32 %v1536_v47, %v1441_v48 }
 0xe8b   :  { %v1792_v50 = vpop.f32.mrf.mxu0 }
 0xe8c   :  { %1448 = vst.msk [vmem:[#allocation2] sm:$0x3] %vm1447_vm5, %v1442_v49 }
 0xe8d   :  { %v1444_v51 = vpop.f32.mrf.mxu0 }
 0xe8e   :  { %1850 = shalt.err (!%p1847_p4)
}
 0xe8f   :  { %1458 = dma.vmem_to_hbm [thread:$0]  %s1456_s19, 32, %s2221_s21, [#allocation3]   ;;  %v1793_v52 = vpop.f32.mrf.mxu0 }
 0xe90   :  { %1859 = dma.done.wait [#allocation3], 32  }
 0xe91   :  { %1860 = vsyncadd [#allocation3], 4294967264 }
 0xe92   :  { %1462 = vsyncpa [#allocation3], 1 }

</bundles_post_ra>
